<compile_context>
chip_gen: v7x
topology: tpu7x:2x2x1
jax: 0.10.0
libtpu: 0.0.40
codegen_flags: <defaults>
</compile_context>

<pallas_src>
import jax
import jax.numpy as jnp
from jax.experimental import pallas as pl
from jax.experimental.pallas import tpu as pltpu


def _mish_kernel(x_ref, o_ref):
    x = x_ref[...].astype(jnp.float32)
    # mish(x) = x * tanh(softplus(x)); with t = e^x:
    #   tanh(log(1 + t)) = (t^2 + 2t) / (t^2 + 2t + 2)
    # Evaluate with u = e^{-|x|} in (0, 1] (never overflows):
    #   x >= 0 (t = 1/u): (1 + 2u)      / (1 + 2u + 2u^2)
    #   x <  0 (t = u)  : (u^2 + 2u)    / (u^2 + 2u + 2)
    u = jnp.exp(-jnp.abs(x))            # EUP op #1
    u2 = u * u
    pos = x >= 0.0
    num = jnp.where(pos, 1.0 + 2.0 * u, u2 + 2.0 * u)
    den = jnp.where(pos, 1.0 + 2.0 * u + 2.0 * u2, u2 + 2.0 * u + 2.0)  # den in (1, 5]
    inv = pl.reciprocal(den, approx=True)  # EUP op #2 (stays on the EUP slot)
    # One Newton-Raphson refinement (pure VPU, hidden under the memory bound)
    # to recover full f32 accuracy from the approximate EUP reciprocal.
    inv = inv * (2.0 - den * inv)
    o_ref[...] = (x * num * inv).astype(o_ref.dtype)


def mish(x):
    """Elementwise Mish on an arbitrary-shaped array (e.g. NCHW activations)."""
    orig_shape = x.shape
    orig_dtype = x.dtype
    total = x.size
    lane = 128

    if total % lane == 0:
        # Free layout change — no extra HBM pass.
        x2d = x.reshape(total // lane, lane)
        ragged = False
    else:
        # TODO(synk): rare ragged-tail path — could be handled fully in-kernel
        # (scalar-prefetched length + masked store) instead of this pad copy.
        pad = lane - (total % lane)
        x2d = jnp.pad(x.reshape(-1), (0, pad)).reshape(-1, lane)
        ragged = True

    rows = x2d.shape[0]
    # 2048 x 128 x 4 B = 1 MiB per f32 block (0.5 MiB for bf16 inputs).
    # If the whole array is smaller, take it as a single full-extent block.
    tile_rows = min(rows, 2048)
    grid = pl.cdiv(rows, tile_rows)

    out2d = pl.pallas_call(
        _mish_kernel,
        out_shape=jax.ShapeDtypeStruct((rows, lane), orig_dtype),
        grid=(grid,),
        in_specs=[pl.BlockSpec((tile_rows, lane), lambda i: (i, 0))],
        out_specs=pl.BlockSpec((tile_rows, lane), lambda i: (i, 0)),
        compiler_params=pltpu.CompilerParams(
            # Parallel grid axis => sharded across the 2 TensorCores on v7x.
            dimension_semantics=("parallel",),
        ),
    )(x2d)

    out_flat = out2d.reshape(-1)
    if ragged:
        out_flat = out_flat[:total]
    return out_flat.reshape(orig_shape)


if __name__ == "__main__":
    key = jax.random.PRNGKey(0)
    # NCHW activation consistent with the conv backbone: [B=2, C=4, H=16, W=16]
    x = jax.random.normal(key, (2, 4, 16, 16), dtype=jnp.float32) * 3.0

    y = mish(x)
    jax.block_until_ready(y)

    # Reference check in plain JAX: x * tanh(softplus(x)).
    y_ref = x * jnp.tanh(jnp.logaddexp(x, 0.0))
    assert y.shape == x.shape and y.dtype == x.dtype
    assert jnp.allclose(y, y_ref, atol=1e-5, rtol=1e-4), "mismatch vs reference"

    print("KERNEL_OK")
</pallas_src>

<mosaic_0001>
module attributes {stable_mosaic.version = 11 : i64} {
  func.func @_mish_kernel(%arg0: i32, %arg1: memref<16x128xf32, #tpu.memory_space<vmem>>, %arg2: memref<16x128xf32, #tpu.memory_space<vmem>>) attributes {dimension_semantics = [#tpu.dimension_semantics<parallel>], iteration_bounds = array<i64: 1>, scalar_prefetch = 0 : i64, scratch_operands = 0 : i64, tpu.core_type = #tpu.core_type<tc>, window_params = [{transform_indices = @transform_0, window_bounds = array<i64: 16, 128>}, {transform_indices = @transform_1, window_bounds = array<i64: 16, 128>}]} {
    %c0 = arith.constant 0 : index
    %c0_0 = arith.constant 0 : index
    %0 = vector.load %arg1[%c0, %c0_0] : memref<16x128xf32, #tpu.memory_space<vmem>>, vector<16x128xf32>
    %1 = math.absf %0 : vector<16x128xf32>
    %cst = arith.constant 0.000000e+00 : f32
    %2 = vector.broadcast %cst : f32 to vector<16x128xf32>
    %3 = arith.subf %2, %1 : vector<16x128xf32>
    %4 = math.exp %3 : vector<16x128xf32>
    %5 = arith.mulf %4, %4 : vector<16x128xf32>
    %cst_1 = arith.constant 0.000000e+00 : f32
    %6 = vector.broadcast %cst_1 : f32 to vector<16x128xf32>
    %7 = arith.cmpf oge, %0, %6 : vector<16x128xf32>
    %cst_2 = arith.constant 2.000000e+00 : f32
    %8 = vector.broadcast %cst_2 : f32 to vector<16x128xf32>
    %9 = arith.mulf %8, %4 : vector<16x128xf32>
    %cst_3 = arith.constant 1.000000e+00 : f32
    %10 = vector.broadcast %cst_3 : f32 to vector<16x128xf32>
    %11 = arith.addf %10, %9 : vector<16x128xf32>
    %cst_4 = arith.constant 2.000000e+00 : f32
    %12 = vector.broadcast %cst_4 : f32 to vector<16x128xf32>
    %13 = arith.mulf %12, %4 : vector<16x128xf32>
    %14 = arith.addf %5, %13 : vector<16x128xf32>
    %15 = arith.select %7, %11, %14 : vector<16x128xi1>, vector<16x128xf32>
    %cst_5 = arith.constant 2.000000e+00 : f32
    %16 = vector.broadcast %cst_5 : f32 to vector<16x128xf32>
    %17 = arith.mulf %16, %4 : vector<16x128xf32>
    %cst_6 = arith.constant 1.000000e+00 : f32
    %18 = vector.broadcast %cst_6 : f32 to vector<16x128xf32>
    %19 = arith.addf %18, %17 : vector<16x128xf32>
    %cst_7 = arith.constant 2.000000e+00 : f32
    %20 = vector.broadcast %cst_7 : f32 to vector<16x128xf32>
    %21 = arith.mulf %20, %5 : vector<16x128xf32>
    %22 = arith.addf %19, %21 : vector<16x128xf32>
    %cst_8 = arith.constant 2.000000e+00 : f32
    %23 = vector.broadcast %cst_8 : f32 to vector<16x128xf32>
    %24 = arith.mulf %23, %4 : vector<16x128xf32>
    %25 = arith.addf %5, %24 : vector<16x128xf32>
    %cst_9 = arith.constant 2.000000e+00 : f32
    %26 = vector.broadcast %cst_9 : f32 to vector<16x128xf32>
    %27 = arith.addf %25, %26 : vector<16x128xf32>
    %28 = arith.select %7, %22, %27 : vector<16x128xi1>, vector<16x128xf32>
    %29 = tpu.reciprocal %28 {approx = true} : vector<16x128xf32> -> vector<16x128xf32>
    %30 = arith.mulf %28, %29 : vector<16x128xf32>
    %cst_10 = arith.constant 2.000000e+00 : f32
    %31 = vector.broadcast %cst_10 : f32 to vector<16x128xf32>
    %32 = arith.subf %31, %30 : vector<16x128xf32>
    %33 = arith.mulf %29, %32 : vector<16x128xf32>
    %34 = arith.mulf %0, %15 : vector<16x128xf32>
    %35 = arith.mulf %34, %33 : vector<16x128xf32>
    %c0_11 = arith.constant 0 : index
    %c0_12 = arith.constant 0 : index
    %36 = vector.load %arg2[%c0_11, %c0_12] : memref<16x128xf32, #tpu.memory_space<vmem>>, vector<16x128xf32>
    tpu.vector_store %arg2[%c0_11, %c0_12], %35 {strides = array<i32>} : memref<16x128xf32, #tpu.memory_space<vmem>>, vector<16x128xf32>,
    return
  }
  func.func @transform_0(%arg0: i32) -> (i32, i32) {
    %c0_i32 = arith.constant 0 : i32
    %c0_i32_0 = arith.constant 0 : i32
    return %arg0, %c0_i32 : i32, i32
  }
  func.func @transform_1(%arg0: i32) -> (i32, i32) {
    %c0_i32 = arith.constant 0 : i32
    %c0_i32_0 = arith.constant 0 : i32
    return %arg0, %c0_i32 : i32, i32
  }
}

</mosaic_0001>

<bundles_post_ra>
// kernel: tpu_custom_call.1
= control target key start
LH: loop header
LB: loop body
LE: loop exit
PB: predicated region body
PF: predicated region fallthrough
CT: control target
= control target key end

     0   :  { %6 = vsyncpa [#allocation3], 0  ;;  %s188_s0 = inlined_call_operand.hbm [shape: f32[16,128], index: 0, kind: input, shape index: {}]   ;;  %s189_s1 = inlined_call_operand.hbm [shape: f32[16,128], index: 1, kind: output, shape index: {}]  }
   0x1   :  { %7 = vsyncpa [#allocation4], 0  ;;  %s144_s6 = smov [#allocation2]   ;;  %s96_s10 = scalar_lea.hbm %s188_s0, 256 }
   0x2   :  { %s13_s7 = sshll.u32 %s144_s6, 4  ;;  %p97_p0 = scmp.ne.s32.totalorder %s188_s0, %s96_s10  ;;  %s14_s7 = int_to_ptr.vmem [resolvable:$true] %s13_s7 }
   0x3   :  { %p100_p1 = scmp.lt.u32.totalorder %s96_s10, %s188_s0 }
   0x5   :  { %p102_p2 = pnand %p100_p1, %p97_p0 }
   0x7   :  { %105 = shalt.err (!%p102_p2)
}
   0x8   :  { %s106_s15 = scalar_lea.vmem %s14_s7, 256  ;;  %p111_p4 = scmp.lt.s32.totalorder %s14_s7, %s14_s7 }
   0x9   :  { %p107_p3 = scmp.ne.s32.totalorder %s14_s7, %s106_s15  ;;  %p112_p5 = scmp.lt.s32.totalorder %s106_s15, %s106_s15 }
   0xb   :  { %p113_p6 = por %p112_p5, %p111_p4 }
   0xd   :  { %p114_p7 = pnand %p113_p6, %p107_p3 }
   0xf   :  { %117 = shalt.err (!%p114_p7)
}
  0x10   :  { %s145_s16 = smov 128   ;;  %s146_s17 = smov 8  }
  0x11   :  { %19 = dma.hbm_to_vmem [thread:$0]  %s188_s0, 256, %s14_s7, [#allocation3], %s145_s16, %s145_s16, %s146_s17  }
  0x12   :  { %140 = dma.done.wait [#allocation3], 256  }
  0x13   :  { %141 = vsyncadd [#allocation3], 4294967040  ;;  %v23_v0 = vld [vmem:[#allocation2] sm:$0xff]  ;;  %v24_v1 = vld [vmem:[#allocation2 + $0x8] sm:$0xff]  ;;  %s147_s0 = smov [#allocation5]  }
  0x14   :  { %v25_v2 = vand.u32 2147483647, %v23_v0  ;;  %v26_v3 = vand.u32 2147483647, %v24_v1  ;;  %vm35_vm0 = vcmp.ge.f32.partialorder %v23_v0, 0.0  ;;  %vm36_vm1 = vcmp.ge.f32.partialorder %v24_v1, 0.0 }
  0x15   :  { %s72_s20 = sshll.u32 %s147_s0, 4  ;;  %s73_s20 = int_to_ptr.vmem [resolvable:$true] %s72_s20 }
  0x16   :  { %v27_v4 = vsub.f32 0.0, %v25_v2  ;;  %v28_v5 = vsub.f32 0.0, %v26_v3  ;;  %s118_s21 = scalar_lea.vmem %s73_s20, 256  ;;  %p123_p9 = scmp.lt.s32.totalorder %s73_s20, %s73_s20 }
  0x17   :  { %p119_p8 = scmp.ne.s32.totalorder %s73_s20, %s118_s21  ;;  %p124_p10 = scmp.lt.s32.totalorder %s118_s21, %s118_s21 }
  0x18   :  { %v29_v6 = vmul.f32 1.442695, %v27_v4  ;;  %v31_v7 = vmul.f32 1.442695, %v28_v5 }
  0x19   :  { %p125_p11 = por %p124_p10, %p123_p9 }
  0x1a   :  { %88 = vpow2.f32 %v29_v6 }
  0x1b   :  { %90 = vpow2.f32 %v31_v7  ;;  %p126_p12 = pnand %p125_p11, %p119_p8 }
  0x24   :  { %v89_v8 = vpop.eup %88 }
  0x25   :  { %v91_v9 = vpop.eup %90  ;;  %v33_v10 = vmul.f32 %v89_v8, %v89_v8  ;;  %v37_v11 = vmul.f32 2.0, %v89_v8 }
  0x26   :  { %v34_v12 = vmul.f32 %v91_v9, %v91_v9  ;;  %v38_v13 = vmul.f32 2.0, %v91_v9 }
  0x27   :  { %v39_v14 = vadd.f32 1.0, %v37_v11  ;;  %v41_v15 = vadd.f32 %v37_v11, %v33_v10  ;;  %v45_v16 = vmul.f32 2.0, %v33_v10 }
  0x28   :  { %v40_v17 = vadd.f32 1.0, %v38_v13  ;;  %v42_v18 = vadd.f32 %v38_v13, %v34_v12  ;;  %v46_v19 = vmul.f32 2.0, %v34_v12 }
  0x29   :  { %v47_v20 = vadd.f32 %v45_v16, %v39_v14  ;;  %v49_v21 = vadd.f32 2.0, %v41_v15  ;;  %v43_v27 = vsel %vm35_vm0, %v39_v14, %v41_v15 }
  0x2a   :  { %v48_v22 = vadd.f32 %v46_v19, %v40_v17  ;;  %v50_v23 = vadd.f32 2.0, %v42_v18  ;;  %v44_v30 = vsel %vm36_vm1, %v40_v17, %v42_v18  ;;  %v61_v33 = vmul.f32 %v43_v27, %v23_v0 }
  0x2b   :  { %v51_v24 = vsel %vm35_vm0, %v47_v20, %v49_v21  ;;  %v62_v35 = vmul.f32 %v44_v30, %v24_v1 }
  0x2c   :  { %92 = vrcp.f32 %v51_v24  ;;  %v52_v25 = vsel %vm36_vm1, %v48_v22, %v50_v23 }
  0x2d   :  { %94 = vrcp.f32 %v52_v25 }
  0x36   :  { %v93_v26 = vpop.eup %92 }
  0x37   :  { %v95_v28 = vpop.eup %94  ;;  %v55_v29 = vmul.f32 %v93_v26, %v51_v24 }
  0x38   :  { %v56_v31 = vmul.f32 %v95_v28, %v52_v25 }
  0x39   :  { %v57_v32 = vsub.f32 2.0, %v55_v29 }
  0x3a   :  { %v58_v34 = vsub.f32 2.0, %v56_v31 }
  0x3b   :  { %v59_v36 = vmul.f32 %v93_v26, %v57_v32 }
  0x3c   :  { %v60_v37 = vmul.f32 %v95_v28, %v58_v34 }
  0x3d   :  { %v63_v38 = vmul.f32 %v61_v33, %v59_v36 }
  0x3e   :  { %v64_v39 = vmul.f32 %v62_v35, %v60_v37 }
  0x3f   :  { %65 = vst [vmem:[#allocation5] sm:$0xff] %v63_v38 }
  0x40   :  { %66 = vst [vmem:[#allocation5 + $0x8] sm:$0xff] %v64_v39 }
  0x41   :  { %129 = shalt.err (!%p126_p12)
}
  0x42   :  { %s130_s24 = scalar_lea.hbm %s189_s1, 256 }
  0x43   :  { %p131_p13 = scmp.ne.s32.totalorder %s189_s1, %s130_s24  ;;  %p134_p0 = scmp.lt.u32.totalorder %s130_s24, %s189_s1 }
  0x45   :  { %p136_p1 = pnand %p134_p0, %p131_p13 }
  0x47   :  { %139 = shalt.err (!%p136_p1)
}
  0x48   :  { %78 = dma.vmem_to_hbm [thread:$0]  %s73_s20, 256, %s189_s1, [#allocation4], %s145_s16, %s145_s16, %s146_s17  }
  0x49   :  { %142 = dma.done.wait [#allocation4], 256  }
  0x4a   :  { %143 = vsyncadd [#allocation4], 4294967040 }
  0x4b   :  { %82 = vsyncpa [#allocation3], 1 }
  0x4c   :  { %83 = vsyncpa [#allocation4], 1 }

</bundles_post_ra>
